<compile_context>
chip_gen: v7x
topology: tpu7x:2x2x1
jax: 0.10.0
libtpu: 0.0.40
codegen_flags: <defaults>
</compile_context>

<pallas_src>
import functools

import jax
import jax.numpy as jnp
from jax.experimental import pallas as pl
from jax.experimental.pallas import tpu as pltpu


def _round_up(x: int, m: int) -> int:
    return ((x + m - 1) // m) * m


def _largest_divisor_leq(n: int, cap: int) -> int:
    cap = max(1, min(cap, n))
    for d in range(cap, 0, -1):
        if n % d == 0:
            return d
    return 1


def _vmem_capacity_bytes() -> int:
    try:
        cap = int(pltpu.get_tpu_info().vmem_capacity_bytes)
        if cap > 0:
            return cap
    except Exception:
        pass
    return 64 << 20  # conservative fallback (v7x-sized per-core VMEM)


# ----------------------------------------------------------------------------
# Kernel
# ----------------------------------------------------------------------------
def _fc_block_kernel(x_ref, w_ref, p_ref, o_ref, *maybe_acc,
                     eps, inv_d_out, compute_dtype, nk):
    """One grid step: partial matmul on the MXU; on the last K step the
    epilogue applies bias + ReLU + LayerNorm (gamma/beta)."""

    def epilogue(acc):
        bias = p_ref[0:1, :]
        gamma = p_ref[1:2, :]
        beta = p_ref[2:3, :]
        mask = p_ref[3:4, :]      # 1.0 for real output columns, 0.0 for padding
        # Bias add fused with ReLU.  Padded output columns are exactly 0 here
        # (W and bias are zero-padded -- invariant maintained by
        # prepare_fc_block_params), so the plain sum / true-D_out divide gives
        # the correct mean.  The centered sum of squares is explicitly masked,
        # making the variance a robust two-pass computation.
        h = jnp.maximum(acc + bias, 0.0)
        mean = jnp.sum(h, axis=-1, keepdims=True) * inv_d_out
        d = (h - mean) * mask
        var = jnp.sum(d * d, axis=-1, keepdims=True) * inv_d_out
        out = d * jax.lax.rsqrt(var + eps) * gamma + beta
        o_ref[...] = out.astype(o_ref.dtype)

    x = x_ref[...]
    if compute_dtype is not None:
        # In-kernel cast (e.g. f32 -> bf16 for the MXU): avoids a separate
        # wrapper-side astype pass over x in HBM.
        x = x.astype(compute_dtype)
    part = jnp.dot(x, w_ref[...], preferred_element_type=jnp.float32)

    if nk == 1:
        # Resident-weight fast path: no accumulator round-trip at all.
        epilogue(part)
        return

    # Streaming K: accumulate in f32.  For f32 outputs we accumulate directly
    # into o_ref (constant block index along k -> resident across the K axis);
    # otherwise a VMEM scratch is provided.
    acc_ref = maybe_acc[0] if maybe_acc else o_ref
    k = pl.program_id(1)

    @pl.when(k == 0)
    def _():
        acc_ref[...] = part            # no read-modify-write on the first step

    @pl.when(k != 0)
    def _():
        acc_ref[...] = acc_ref[...] + part

    @pl.when(k == nk - 1)
    def _():
        epilogue(acc_ref[...])


# ----------------------------------------------------------------------------
# Parameter preparation (do this once; params are static across calls)
# ----------------------------------------------------------------------------
def prepare_fc_block_params(w, b, gamma, beta, *, compute_dtype=None):
    """Pad / cast the parameters once.

    w: (D_in, D_out)  (transposed vs. torch nn.Linear.weight)
    Returns (w_padded, packed_params, d_in, d_out) where packed_params rows
    are [bias, ln_gamma, ln_beta, valid-column mask] in f32.

    Zero padding of W and bias keeps padded output columns of the activation
    exactly 0 after ReLU -- the kernel's LayerNorm mean relies on that
    invariant (the variance additionally uses the explicit mask).
    """
    D_in, D_out = w.shape
    K_p = _round_up(D_in, 128)
    N_p = _round_up(D_out, 128)
    cdtype = compute_dtype if compute_dtype is not None else w.dtype

    w_padded = jnp.pad(w.astype(cdtype), ((0, K_p - D_in), (0, N_p - D_out)))

    def pad1(v):
        return jnp.pad(v.astype(jnp.float32), (0, N_p - D_out))

    mask = (jnp.arange(N_p) < D_out).astype(jnp.float32)
    packed = jnp.stack([pad1(b), pad1(gamma), pad1(beta), mask])   # (4, N_p)
    return w_padded, packed, D_in, D_out


# ----------------------------------------------------------------------------
# Apply (the actual pallas_call)
# ----------------------------------------------------------------------------
def fc_block_apply(x, w_padded, packed_params, d_in, d_out, *, eps=1e-5,
                   block_b=512, block_k=512, allow_resident_weight=True):
    """LayerNorm(ReLU(x @ W + b)) with pre-prepared (padded/cast) parameters."""
    B = x.shape[0]
    assert x.shape[1] == d_in, (x.shape, d_in)
    K_p, N_p = w_padded.shape
    out_dtype = x.dtype

    wsz = jnp.dtype(w_padded.dtype).itemsize
    xsz = jnp.dtype(x.dtype).itemsize
    osz = jnp.dtype(out_dtype).itemsize

    # x is cast inside the kernel when its dtype differs from the weight's
    # (e.g. f32 activations with bf16 weights).
    kern_cast = w_padded.dtype if w_padded.dtype != x.dtype else None

    # Pad x along K only when needed (zero pad -> exact reduction).
    x_in = x if K_p == d_in else jnp.pad(x, ((0, 0), (0, K_p - d_in)))

    # ---- per-generation VMEM budget ---------------------------------------
    cap = _vmem_capacity_bytes()                    # 128 MiB v5e/v6e, 64 MiB v7x
    vmem_limit = max(32 << 20, cap - (8 << 20))     # ~120 MiB / ~56 MiB
    budget = vmem_limit - (8 << 20)                 # tile budget w/ headroom

    # ---- K tile: keep the whole weight resident when it fits --------------
    # (x2 because the default pipeline double-buffers; with a constant block
    #  index it is still only DMA'd from HBM once.)
    if allow_resident_weight and 2 * K_p * N_p * wsz <= (budget * 3) // 5:
        tk = K_p
    else:
        tk_cap = max(128, min(block_k, (budget // 4) // (N_p * wsz)))
        tk = 128 * _largest_divisor_leq(K_p // 128, tk_cap // 128)
    nk = K_p // tk

    use_out_as_acc = (out_dtype == jnp.float32)
    need_scratch = (nk > 1) and (not use_out_as_acc)

    # ---- batch tile --------------------------------------------------------
    w_vmem = 2 * tk * N_p * wsz
    per_row = 2 * tk * xsz + 2 * N_p * osz + (N_p * 4 if need_scratch else 0)
    bb_cap = max(8, ((budget - w_vmem) // per_row) // 8 * 8)
    bb = min(block_b, bb_cap, _round_up(B, 8))
    # With a resident weight, keep >= 2 batch tiles so the "parallel" batch
    # axis can shard across v7x's two TensorCores (free: no extra weight DMA).
    if nk == 1 and B > 8:
        bb = min(bb, _round_up(-(-B // 2), 8))
    bb = max(8, bb)

    grid = (pl.cdiv(B, bb), nk)      # reduction (K) axis last

    kernel = functools.partial(_fc_block_kernel,
                               eps=float(eps),
                               inv_d_out=1.0 / float(d_out),
                               compute_dtype=kern_cast,
                               nk=int(nk))

    scratch = [pltpu.VMEM((bb, N_p), jnp.float32)] if need_scratch else []

    cost = pl.CostEstimate(
        flops=2 * B * d_in * d_out,
        transcendentals=B,                                     # rsqrt per row
        bytes_accessed=(B * d_in * xsz + K_p * N_p * wsz
                        + B * d_out * osz + 4 * N_p * 4),
    )

    out_p = pl.pallas_call(
        kernel,
        out_shape=jax.ShapeDtypeStruct((B, N_p), out_dtype),
        grid_spec=pltpu.PrefetchScalarGridSpec(
            num_scalar_prefetch=0,
            grid=grid,
            in_specs=[
                pl.BlockSpec((bb, tk), lambda i, k: (i, k)),    # x tile
                pl.BlockSpec((tk, N_p), lambda i, k: (k, 0)),   # weight K-slab
                pl.BlockSpec((4, N_p), lambda i, k: (0, 0)),    # b/gamma/beta/mask
            ],
            out_specs=pl.BlockSpec((bb, N_p), lambda i, k: (i, 0)),
            scratch_shapes=scratch,
        ),
        compiler_params=pltpu.CompilerParams(
            dimension_semantics=("parallel", "arbitrary"),
            vmem_limit_bytes=int(vmem_limit),
        ),
        cost_estimate=cost,
    )(x_in, w_padded, packed_params)

    return out_p if N_p == d_out else out_p[:, :d_out]


def fc_block(x, w, b, gamma, beta, *, eps=1e-5, block_b=512, block_k=512,
             compute_dtype=None, allow_resident_weight=True):
    """Convenience one-shot wrapper (prepares params every call)."""
    w_p, packed, d_in, d_out = prepare_fc_block_params(
        w, b, gamma, beta, compute_dtype=compute_dtype)
    return fc_block_apply(x, w_p, packed, d_in, d_out, eps=eps,
                          block_b=block_b, block_k=block_k,
                          allow_resident_weight=allow_resident_weight)


# ----------------------------------------------------------------------------
# Reference
# ----------------------------------------------------------------------------
def fc_block_ref(x, w, b, gamma, beta, eps=1e-5):
    h = jnp.maximum(x @ w + b, 0.0)
    mean = h.mean(-1, keepdims=True)
    var = ((h - mean) ** 2).mean(-1, keepdims=True)
    return (h - mean) / jnp.sqrt(var + eps) * gamma + beta


if __name__ == "__main__":
    key = jax.random.PRNGKey(0)
    kx, kw, kb, kg, kb2 = jax.random.split(key, 5)

    # ---- Test 1: small module-sized shapes (resident weight, single tile) --
    batch, d_in, d_out = 8, 32, 32
    x = jax.random.normal(kx, (batch, d_in), dtype=jnp.float32)
    bound = 1.0 / (d_in ** 0.5)
    w = jax.random.uniform(kw, (d_in, d_out), jnp.float32, -bound, bound)
    b = jax.random.uniform(kb, (d_out,), jnp.float32, -bound, bound)
    gamma = jnp.ones((d_out,), jnp.float32)      # nn.LayerNorm default init
    beta = jnp.zeros((d_out,), jnp.float32)

    out = jax.block_until_ready(fc_block(x, w, b, gamma, beta))
    ref = fc_block_ref(x, w, b, gamma, beta)
    assert out.shape == (batch, d_out)
    assert jnp.allclose(out, ref, atol=1e-4, rtol=1e-4), "f32 small-shape mismatch"

    # ---- Test 2: non-aligned shapes, multiple batch tiles + edge block -----
    batch2, d_in2, d_out2 = 260, 200, 72
    x2 = jax.random.normal(kx, (batch2, d_in2), dtype=jnp.float32)
    bound2 = 1.0 / (d_in2 ** 0.5)
    w2 = jax.random.uniform(kw, (d_in2, d_out2), jnp.float32, -bound2, bound2)
    b2 = jax.random.uniform(kb, (d_out2,), jnp.float32, -bound2, bound2)
    g2 = 1.0 + 0.1 * jax.random.normal(kg, (d_out2,), jnp.float32)
    be2 = 0.1 * jax.random.normal(kb2, (d_out2,), jnp.float32)

    out2 = jax.block_until_ready(fc_block(x2, w2, b2, g2, be2))
    ref2 = fc_block_ref(x2, w2, b2, g2, be2)
    assert out2.shape == (batch2, d_out2)
    assert jnp.allclose(out2, ref2, atol=1e-4, rtol=1e-4), "f32 tiled mismatch"

    # ---- Test 3: bf16 weights (in-kernel x cast), forced K streaming -------
    out3 = jax.block_until_ready(
        fc_block(x2, w2, b2, g2, be2, compute_dtype=jnp.bfloat16,
                 block_k=128, allow_resident_weight=False))
    assert out3.shape == (batch2, d_out2)
    assert jnp.allclose(out3, ref2, atol=1e-1, rtol=1e-1), "bf16-weight mismatch"

    # ---- Test 4: bf16 activations/weights/output, scratch-accumulator path -
    x2b = x2.astype(jnp.bfloat16)
    out4 = jax.block_until_ready(
        fc_block(x2b, w2, b2, g2, be2, compute_dtype=jnp.bfloat16,
                 block_k=128, allow_resident_weight=False))
    ref4 = fc_block_ref(x2b.astype(jnp.float32),
                        w2.astype(jnp.bfloat16).astype(jnp.float32),
                        b2, g2, be2)
    assert out4.shape == (batch2, d_out2)
    assert out4.dtype == jnp.bfloat16
    assert jnp.allclose(out4.astype(jnp.float32), ref4, atol=1.5e-1, rtol=1.5e-1), \
        "bf16 end-to-end mismatch"

    print("KERNEL_OK")
</pallas_src>

<mosaic_0001>
module attributes {stable_mosaic.version = 11 : i64} {
  func.func @_fc_block_kernel(%arg0: i32, %arg1: i32, %arg2: memref<8x128xf32, #tpu.memory_space<vmem>>, %arg3: memref<128x128xf32, #tpu.memory_space<vmem>>, %arg4: memref<4x128xf32, #tpu.memory_space<vmem>>, %arg5: memref<8x128xf32, #tpu.memory_space<vmem>>) attributes {dimension_semantics = [#tpu.dimension_semantics<parallel>, #tpu.dimension_semantics<arbitrary>], iteration_bounds = array<i64: 1, 1>, scalar_prefetch = 0 : i64, scratch_operands = 0 : i64, tpu.core_type = #tpu.core_type<tc>, window_params = [{transform_indices = @transform_0, window_bounds = array<i64: 8, 128>}, {transform_indices = @transform_1, window_bounds = array<i64: 128, 128>}, {pipeline_mode = #tpu.pipeline_mode<synchronous>, transform_indices = @transform_2, window_bounds = array<i64: 4, 128>}, {transform_indices = @transform_3, window_bounds = array<i64: 8, 128>}]} {
    %c0 = arith.constant 0 : index
    %c0_0 = arith.constant 0 : index
    %0 = vector.load %arg2[%c0, %c0_0] : memref<8x128xf32, #tpu.memory_space<vmem>>, vector<8x128xf32>
    %c0_1 = arith.constant 0 : index
    %c0_2 = arith.constant 0 : index
    %1 = vector.load %arg3[%c0_1, %c0_2] : memref<128x128xf32, #tpu.memory_space<vmem>>, vector<128x128xf32>
    %cst = arith.constant dense<0.000000e+00> : vector<8x128xf32>
    %2 = tpu.matmul %0, %1, %cst {dimension_numbers = #tpu.dot_dimension_numbers<[1], [0], [0], [1], [0, 0, 1, 1], [], []>} : vector<8x128xf32>, vector<128x128xf32>, vector<8x128xf32> -> vector<8x128xf32>
    %c0_3 = arith.constant 0 : index
    %c0_4 = arith.constant 0 : index
    %3 = vector.load %arg4[%c0_3, %c0_4] : memref<4x128xf32, #tpu.memory_space<vmem>>, vector<1x128xf32>
    %c1 = arith.constant 1 : index
    %c0_5 = arith.constant 0 : index
    %4 = vector.load %arg4[%c1, %c0_5] : memref<4x128xf32, #tpu.memory_space<vmem>>, vector<1x128xf32>
    %c2 = arith.constant 2 : index
    %c0_6 = arith.constant 0 : index
    %5 = vector.load %arg4[%c2, %c0_6] : memref<4x128xf32, #tpu.memory_space<vmem>>, vector<1x128xf32>
    %c3 = arith.constant 3 : index
    %c0_7 = arith.constant 0 : index
    %6 = vector.load %arg4[%c3, %c0_7] : memref<4x128xf32, #tpu.memory_space<vmem>>, vector<1x128xf32>
    %7 = vector.broadcast %3 : vector<1x128xf32> to vector<8x128xf32>
    %8 = arith.addf %2, %7 : vector<8x128xf32>
    %cst_8 = arith.constant 0.000000e+00 : f32
    %9 = vector.broadcast %cst_8 : f32 to vector<8x128xf32>
    %10 = arith.maximumf %8, %9 : vector<8x128xf32>
    %cst_9 = arith.constant dense<0.000000e+00> : vector<8xf32>
    %11 = vector.multi_reduction <add>, %10, %cst_9 [1] : vector<8x128xf32> to vector<8xf32>
    %12 = vector.shape_cast %11 : vector<8xf32> to vector<8x1xf32>
    %cst_10 = arith.constant 3.125000e-02 : f32
    %13 = vector.broadcast %cst_10 : f32 to vector<8x1xf32>
    %14 = arith.mulf %12, %13 : vector<8x1xf32>
    %15 = vector.broadcast %14 : vector<8x1xf32> to vector<8x128xf32>
    %16 = arith.subf %10, %15 : vector<8x128xf32>
    %17 = vector.broadcast %6 : vector<1x128xf32> to vector<8x128xf32>
    %18 = arith.mulf %16, %17 : vector<8x128xf32>
    %19 = arith.mulf %18, %18 : vector<8x128xf32>
    %cst_11 = arith.constant dense<0.000000e+00> : vector<8xf32>
    %20 = vector.multi_reduction <add>, %19, %cst_11 [1] : vector<8x128xf32> to vector<8xf32>
    %21 = vector.shape_cast %20 : vector<8xf32> to vector<8x1xf32>
    %cst_12 = arith.constant 3.125000e-02 : f32
    %22 = vector.broadcast %cst_12 : f32 to vector<8x1xf32>
    %23 = arith.mulf %21, %22 : vector<8x1xf32>
    %cst_13 = arith.constant 9.99999974E-6 : f32
    %24 = vector.broadcast %cst_13 : f32 to vector<8x1xf32>
    %25 = arith.addf %23, %24 : vector<8x1xf32>
    %26 = math.rsqrt %25 : vector<8x1xf32>
    %27 = vector.broadcast %26 : vector<8x1xf32> to vector<8x128xf32>
    %28 = arith.mulf %18, %27 : vector<8x128xf32>
    %29 = vector.broadcast %4 : vector<1x128xf32> to vector<8x128xf32>
    %30 = arith.mulf %28, %29 : vector<8x128xf32>
    %31 = vector.broadcast %5 : vector<1x128xf32> to vector<8x128xf32>
    %32 = arith.addf %30, %31 : vector<8x128xf32>
    %c0_14 = arith.constant 0 : index
    %c0_15 = arith.constant 0 : index
    %33 = vector.load %arg5[%c0_14, %c0_15] : memref<8x128xf32, #tpu.memory_space<vmem>>, vector<8x128xf32>
    tpu.vector_store %arg5[%c0_14, %c0_15], %32 {strides = array<i32>} : memref<8x128xf32, #tpu.memory_space<vmem>>, vector<8x128xf32>,
    return
  }
  func.func @transform_0(%arg0: i32, %arg1: i32) -> (i32, i32) {
    %c0_i32 = arith.constant 0 : i32
    return %arg0, %arg1 : i32, i32
  }
  func.func @transform_1(%arg0: i32, %arg1: i32) -> (i32, i32) {
    %c0_i32 = arith.constant 0 : i32
    %c0_i32_0 = arith.constant 0 : i32
    return %arg1, %c0_i32 : i32, i32
  }
  func.func @transform_2(%arg0: i32, %arg1: i32) -> (i32, i32) {
    %c0_i32 = arith.constant 0 : i32
    %c0_i32_0 = arith.constant 0 : i32
    %c0_i32_1 = arith.constant 0 : i32
    return %c0_i32, %c0_i32_0 : i32, i32
  }
  func.func @transform_3(%arg0: i32, %arg1: i32) -> (i32, i32) {
    %c0_i32 = arith.constant 0 : i32
    %c0_i32_0 = arith.constant 0 : i32
    return %arg0, %c0_i32 : i32, i32
  }
}

</mosaic_0001>

<bundles_post_ra>
// kernel: tpu_custom_call.1
= control target key start
LH: loop header
LB: loop body
LE: loop exit
PB: predicated region body
PF: predicated region fallthrough
CT: control target
= control target key end

     0   :  { %8 = vsyncpa [#allocation3], 0  ;;  %s425_s0 = inlined_call_operand.hbm [shape: f32[8,128], index: 0, kind: input, shape index: {}]   ;;  %s426_s1 = inlined_call_operand.hbm [shape: f32[128,128], index: 1, kind: input, shape index: {}]   ;;  %s427_s2 = inlined_call_operand.vmem [shape: f32[4,128], index: 2, kind: input, shape index: {}]   ;;  %s428_s3 = inlined_call_operand.hbm [shape: f32[8,128], index: 3, kind: output, shape index: {}]  }
   0x1   :  { %9 = vsyncpa [#allocation6], 0 }
   0x2   :  { %10 = vsyncpa [#allocation4], 0  ;;  %s342_s12 = smov [#allocation2]   ;;  %s343_s14 = smov [#allocation5]  }
   0x3   :  { %s17_s13 = sshll.u32 %s342_s12, 4  ;;  %s26_s15 = sshll.u32 %s343_s14, 4  ;;  %s18_s13 = int_to_ptr.vmem [resolvable:$true] %s17_s13  ;;  %s370_s15 = int_to_ptr.vmem [resolvable:$true] %s26_s15 }
   0x4   :  { %s270_s18 = scalar_lea.hbm %s425_s0, 128 }
   0x5   :  { %p271_p0 = scmp.ne.s32.totalorder %s425_s0, %s270_s18  ;;  %p274_p1 = scmp.lt.u32.totalorder %s270_s18, %s425_s0 }
   0x7   :  { %p276_p2 = pnand %p274_p1, %p271_p0 }
   0x9   :  { %279 = shalt.err (!%p276_p2)
}
   0xa   :  { %s280_s23 = scalar_lea.vmem %s18_s13, 128  ;;  %p285_p4 = scmp.lt.s32.totalorder %s18_s13, %s18_s13 }
   0xb   :  { %p281_p3 = scmp.ne.s32.totalorder %s18_s13, %s280_s23  ;;  %p286_p5 = scmp.lt.s32.totalorder %s280_s23, %s280_s23 }
   0xd   :  { %p287_p6 = por %p286_p5, %p285_p4 }
   0xf   :  { %p288_p7 = pnand %p287_p6, %p281_p3 }
  0x11   :  { %291 = shalt.err (!%p288_p7)
}
  0x12   :  { %20 = dma.hbm_to_vmem [thread:$0]  %s425_s0, 128, %s18_s13, [#allocation3]  }
  0x13   :  { %s292_s28 = scalar_lea.hbm %s426_s1, 2048 }
  0x14   :  { %p293_p8 = scmp.ne.s32.totalorder %s426_s1, %s292_s28  ;;  %p296_p9 = scmp.lt.u32.totalorder %s292_s28, %s426_s1 }
  0x16   :  { %p298_p10 = pnand %p296_p9, %p293_p8 }
  0x18   :  { %301 = shalt.err (!%p298_p10)
}
  0x19   :  { %s302_s6 = scalar_lea.vmem %s370_s15, 2048  ;;  %p307_p12 = scmp.lt.s32.totalorder %s370_s15, %s370_s15 }
  0x1a   :  { %p303_p11 = scmp.ne.s32.totalorder %s370_s15, %s302_s6  ;;  %p308_p13 = scmp.lt.s32.totalorder %s302_s6, %s302_s6 }
  0x1c   :  { %p309_p0 = por %p308_p13, %p307_p12 }
  0x1e   :  { %p310_p1 = pnand %p309_p0, %p303_p11 }
  0x20   :  { %313 = shalt.err (!%p310_p1)
}
  0x21   :  { %s344_s0 = smov 128   ;;  %s345_s7 = smov 8  }
  0x22   :  { %32 = dma.hbm_to_vmem [thread:$0]  %s426_s1, 2048, %s370_s15, [#allocation6], %s344_s0, %s344_s0, %s345_s7  }
  0x23   :  { %336 = dma.done.wait [#allocation3], 128  }
  0x24   :  { %337 = vsyncadd [#allocation3], 4294967168 }
  0x25   :  { %338 = dma.done.wait [#allocation6], 2048  }
  0x26   :  { %339 = vsyncadd [#allocation6], 4294965248  ;;  %v346_v0 = vmov 0.0|0.0   ;;  %vm347_vm0 = vmmov 0   ;;  %v348_v1 = vmov 0.0   ;;  %v42_v2 = vld [vmem:[#allocation5] sm:$0xff] }
  0x27   :  { %236 = vmatprep.subr.bf16.mxu0 %v346_v0  ;;  %233 = vmatprep.mubr.msk.f32.mxu0 %vm347_vm0, %v348_v1  ;;  %v43_v3 = vld [vmem:[#allocation5 + $0x8] sm:$0xff]  ;;  %v44_v4 = vld [vmem:[#allocation5 + $0x10] sm:$0xff]  ;;  %v45_v6 = vld [vmem:[#allocation5 + $0x18] sm:$0xff]  ;;  %s349_s17 = smov [#allocation7]  }
  0x28   :  { %v237_v5 = vpack.c.bf16 %v43_v3, %v42_v2  ;;  %v240_v7 = vpack.c.bf16 %v45_v6, %v44_v4  ;;  %v46_v8 = vld [vmem:[#allocation5 + $0x20] sm:$0xff]  ;;  %v47_v9 = vld [vmem:[#allocation5 + $0x28] sm:$0xff]  ;;  %v48_v11 = vld [vmem:[#allocation5 + $0x30] sm:$0xff]  ;;  %s170_s18 = sshll.u32 %s349_s17, 4  ;;  %s171_s18 = int_to_ptr.vmem [resolvable:$true] %s170_s18 }
  0x29   :  { %v243_v10 = vpack.c.bf16 %v47_v9, %v46_v8  ;;  %v49_v12 = vld [vmem:[#allocation5 + $0x38] sm:$0xff]  ;;  %v50_v14 = vld [vmem:[#allocation5 + $0x40] sm:$0xff]  ;;  %v51_v15 = vld [vmem:[#allocation5 + $0x48] sm:$0xff]  ;;  %s314_s19 = scalar_lea.vmem %s171_s18, 128  ;;  %p319_p3 = scmp.lt.s32.totalorder %s171_s18, %s171_s18 }
  0x2a   :  { %238 = vmatpush3.bf16.msra.mxu0 %v237_v5  ;;  %v246_v13 = vpack.c.bf16 %v49_v12, %v48_v11  ;;  %v249_v16 = vpack.c.bf16 %v51_v15, %v50_v14  ;;  %v52_v17 = vld [vmem:[#allocation5 + $0x50] sm:$0xff]  ;;  %v53_v18 = vld [vmem:[#allocation5 + $0x58] sm:$0xff]  ;;  %v54_v20 = vld [vmem:[#allocation5 + $0x60] sm:$0xff]  ;;  %p315_p2 = scmp.ne.s32.totalorder %s171_s18, %s314_s19  ;;  %p320_p4 = scmp.lt.s32.totalorder %s314_s19, %s314_s19 }
  0x2b   :  { %239 = vmatprep.subr.bf16.mxu0 %v346_v0  ;;  %v252_v19 = vpack.c.bf16 %v53_v18, %v52_v17  ;;  %v55_v21 = vld [vmem:[#allocation5 + $0x68] sm:$0xff]  ;;  %v56_v23 = vld [vmem:[#allocation5 + $0x70] sm:$0xff]  ;;  %v57_v24 = vld [vmem:[#allocation5 + $0x78] sm:$0xff] }
  0x2c   :  { %v255_v22 = vpack.c.bf16 %v55_v21, %v54_v20  ;;  %v258_v25 = vpack.c.bf16 %v57_v24, %v56_v23  ;;  %v41_v26 = vld [vmem:[#allocation2] sm:$0xff]  ;;  %p321_p5 = por %p320_p4, %p319_p3 }
  0x2d   :  { %v180_v27 = vld [vmem:[%s427_s2] ss:$0 sm:$0xff]  ;;  %v181_v34 = vld [vmem:[%s427_s2 + $0x3] ss:$0 sm:$0xff]  ;;  %v182_v42 = vld [vmem:[%s427_s2 + $0x1] ss:$0 sm:$0xff] }
  0x2e   :  { %241 = vmatpush3.bf16.msra.mxu0 %v240_v7  ;;  %v183_v44 = vld [vmem:[%s427_s2 + $0x2] ss:$0 sm:$0xff]  ;;  %p322_p6 = pnand %p321_p5, %p315_p2 }
  0x2f   :  { %242 = vmatprep.subr.bf16.mxu0 %v346_v0 }
  0x32   :  { %244 = vmatpush3.bf16.msra.mxu0 %v243_v10 }
  0x33   :  { %245 = vmatprep.subr.bf16.mxu0 %v346_v0 }
  0x36   :  { %247 = vmatpush3.bf16.msra.mxu0 %v246_v13 }
  0x37   :  { %248 = vmatprep.subr.bf16.mxu0 %v346_v0 }
  0x3a   :  { %250 = vmatpush3.bf16.msra.mxu0 %v249_v16 }
  0x3b   :  { %251 = vmatprep.subr.bf16.mxu0 %v346_v0 }
  0x3e   :  { %253 = vmatpush3.bf16.msra.mxu0 %v252_v19 }
  0x3f   :  { %254 = vmatprep.subr.bf16.mxu0 %v346_v0 }
  0x42   :  { %256 = vmatpush3.bf16.msra.mxu0 %v255_v22 }
  0x43   :  { %257 = vmatprep.subr.bf16.mxu0 %v346_v0 }
  0x46   :  { %259 = vmatpush3.bf16.msra.mxu0 %v258_v25 }
  0x49   :  { %234 = vmatmul.mubr.f32.vlgmr.msra.gmra.mrb[0].mxu0 %v41_v26 }
 0x11c   :  { %v132_v28 = vpop.f32.mrb[0].mxu0 }
 0x11d   :  { %v133_v29 = vadd.f32 %v180_v27, %v132_v28  ;;  %v235_v30 = vpop.f32.mrb[1].mxu0 }
 0x11f   :  { %v136_v31 = vmax.f32 %v133_v29, 0.0 }
 0x121   :  { %137 = vadd.xlane.f32.xlu0 %v136_v31 }
 0x1ae   :  { %v138_v32 = vpop.xlane.xlu0 %137 }
 0x1af   :  { %v139_v33 = vmul.f32 0.03125, %v138_v32 }
 0x1b1   :  { %v140_v35 = vsub.f32 %v136_v31, %v139_v33 }
 0x1b3   :  { %v145_v36 = vmul.f32 %v181_v34, %v140_v35 }
 0x1b5   :  { %v146_v37 = vmul.f32 %v145_v36, %v145_v36 }
 0x1b7   :  { %147 = vadd.xlane.f32.xlu0 %v146_v37 }
 0x244   :  { %v148_v38 = vpop.xlane.xlu0 %147 }
 0x245   :  { %v149_v39 = vmul.f32 0.03125, %v148_v38 }
 0x247   :  { %v150_v40 = vadd.f32 1e-05, %v149_v39 }
 0x249   :  { %268 = vrsqrt.f32 %v150_v40 }
 0x253   :  { %v269_v41 = vpop.eup %268 }
 0x254   :  { %v152_v43 = vmul.f32 %v269_v41, %v145_v36 }
 0x256   :  { %v157_v45 = vmul.f32 %v182_v42, %v152_v43 }
 0x258   :  { %v162_v46 = vadd.f32 %v183_v44, %v157_v45 }
 0x25a   :  { %163 = vst [vmem:[#allocation7] sm:$0xff] %v162_v46 }
 0x25b   :  { %325 = shalt.err (!%p322_p6)
}
 0x25c   :  { %s326_s22 = scalar_lea.hbm %s428_s3, 128 }
 0x25d   :  { %p327_p7 = scmp.ne.s32.totalorder %s428_s3, %s326_s22  ;;  %p330_p8 = scmp.lt.u32.totalorder %s326_s22, %s428_s3 }
 0x25f   :  { %p332_p9 = pnand %p330_p8, %p327_p7 }
 0x261   :  { %335 = shalt.err (!%p332_p9)
}
 0x262   :  { %173 = dma.vmem_to_hbm [thread:$0]  %s171_s18, 128, %s428_s3, [#allocation4]  }
 0x263   :  { %340 = dma.done.wait [#allocation4], 128  }
 0x264   :  { %341 = vsyncadd [#allocation4], 4294967168 }
 0x265   :  { %177 = vsyncpa [#allocation3], 1 }
 0x266   :  { %178 = vsyncpa [#allocation6], 1 }
 0x267   :  { %179 = vsyncpa [#allocation4], 1 }

</bundles_post_ra>
